<compile_context>
chip_gen: v5e
topology: v5e:2x2
jax: 0.10.0
libtpu: 0.0.40
codegen_flags: <defaults>
</compile_context>

<pallas_src>
import jax
import jax.numpy as jnp
from jax.experimental import pallas as pl
from jax.experimental.pallas import tpu as pltpu


def _round_up(x, m):
    return (x + m - 1) // m * m


def _patch_gemm_kernel(p_ref, w_ref, b_ref, o_ref):
    # p_ref: [tm, K]  bf16 patch tile (pipelined over the M grid axis)
    # w_ref: [K, Ep]  bf16 weight (constant index map -> stays resident in VMEM)
    # b_ref: [1, Ep]  f32 bias
    # o_ref: [tm, Ep] output tile (bf16 by default, E on lanes)
    acc = jnp.dot(p_ref[...], w_ref[...], preferred_element_type=jnp.float32)
    o_ref[...] = (acc + b_ref[...]).astype(o_ref.dtype)


def patch_embed_pallas(x, weight, bias, patch_size, *,
                       compute_dtype=jnp.bfloat16,
                       out_dtype=jnp.bfloat16,
                       output_format="nchw",
                       block_m=1024):
    """ViT patch embedding (Conv2d with kernel == stride) on the TPU MXU.

    x:      [B, C, H, W]  (NCHW, any float dtype)
    weight: [E, C, ph, pw] (Conv2d OIHW)
    bias:   [E]
    Returns NCHW [B, E, H//ph, W//pw] (module parity) or token-major
    [B, (H//ph)*(W//pw), E] when output_format == "tokens".
    """
    B, C, H, W = x.shape
    E = weight.shape[0]
    ph, pw = patch_size
    nH, nW = H // ph, W // pw
    M = B * nH * nW
    K = C * ph * pw                      # feature order (C, ph, pw) == OIHW flatten
    Ep = _round_up(E, 128)               # lane-dense stores; no-op for ViT E=768/1024

    # ---- im2col: one fused XLA transpose+convert pass (bf16 materialization) ----
    # [B, C, nH, ph, nW, pw] -> [B, nH, nW, C, ph, pw] -> [M, K]
    patches = x.reshape(B, C, nH, ph, nW, pw)
    patches = patches.transpose(0, 2, 4, 1, 3, 5).reshape(M, K).astype(compute_dtype)

    # ---- weight / bias prep (tiny) ----
    w_mat = weight.reshape(E, K).T.astype(compute_dtype)          # [K, E]
    b_vec = bias.astype(jnp.float32)
    if Ep != E:
        w_mat = jnp.pad(w_mat, ((0, 0), (0, Ep - E)))
        b_vec = jnp.pad(b_vec, (0, Ep - E))
    b_mat = b_vec.reshape(1, Ep)

    # ---- M tile selection ----
    # multiple of 16 (bf16 sublane packing); >= 2 grid steps when M allows so the
    # "parallel" axis feeds both v7x TensorCores; 256-row cadence for large M.
    tm = min(block_m, _round_up(M, 16))
    if M > 16 and pl.cdiv(M, tm) < 2:
        tm = _round_up(pl.cdiv(M, 2), 16)
    if M >= 512:
        tm = _round_up(tm, 256)
    grid_m = pl.cdiv(M, tm)

    # ---- VMEM budget (double-buffered patch/out tiles + resident weight/bias) ----
    in_b = jnp.dtype(compute_dtype).itemsize
    out_b = jnp.dtype(out_dtype).itemsize
    vmem_need = (2 * tm * K * in_b      # patch tiles
                 + 2 * tm * Ep * out_b  # output tiles
                 + 2 * K * Ep * in_b    # weight (2 bufs; see Buffered(1) TODO)
                 + 2 * Ep * 4)          # bias
    vmem_limit = int(min(64 * 2 ** 20, max(32 * 2 ** 20, 2 * vmem_need)))

    cost = pl.CostEstimate(
        flops=2 * M * K * E,
        transcendentals=0,
        bytes_accessed=M * K * in_b + K * Ep * in_b + Ep * 4 + M * Ep * out_b,
    )

    out = pl.pallas_call(
        _patch_gemm_kernel,
        out_shape=jax.ShapeDtypeStruct((M, Ep), out_dtype),
        grid_spec=pltpu.PrefetchScalarGridSpec(
            num_scalar_prefetch=0,
            grid=(grid_m,),
            in_specs=[
                pl.BlockSpec((tm, K), lambda i: (i, 0)),    # patch tile (pipelined)
                pl.BlockSpec((K, Ep), lambda i: (0, 0)),    # weight (VMEM resident)
                pl.BlockSpec((1, Ep), lambda i: (0, 0)),    # bias   (VMEM resident)
            ],
            out_specs=pl.BlockSpec((tm, Ep), lambda i: (i, 0)),
        ),
        compiler_params=pltpu.CompilerParams(
            dimension_semantics=("parallel",),   # megacore-shard M tiles on v7x
            vmem_limit_bytes=vmem_limit,
        ),
        cost_estimate=cost,
    )(patches, w_mat, b_mat)

    if Ep != E:
        out = out[:, :E]

    if output_format == "tokens":
        # Kernel-natural, lane-dense layout: no extra HBM pass.
        return out.reshape(B, nH * nW, E)
    elif output_format == "nchw":
        # nn.Conv2d / module parity (layout plumbing outside the kernel).
        return out.reshape(B, nH, nW, E).transpose(0, 3, 1, 2)
    else:
        raise ValueError(f"unknown output_format: {output_format!r}")


if __name__ == "__main__":
    # Small shapes consistent with the module: img=16, patch=4, C=4, E=32, B=2.
    B, C, H, W = 2, 4, 16, 16
    ph, pw = 4, 4
    E = 32

    key = jax.random.PRNGKey(0)
    kx, kw, kb = jax.random.split(key, 3)

    x = jax.random.normal(kx, (B, C, H, W), dtype=jnp.float32)
    # Deterministic synthetic Conv2d params (shapes from nn.Conv2d(C, E, 4, 4)).
    weight = jax.random.normal(kw, (E, C, ph, pw), dtype=jnp.float32) * 0.02
    bias = jax.random.normal(kb, (E,), dtype=jnp.float32) * 0.02

    # Module-parity NCHW output (default) and the lane-dense token-major option.
    y = jax.block_until_ready(patch_embed_pallas(x, weight, bias, (ph, pw)))
    y_tok = jax.block_until_ready(
        patch_embed_pallas(x, weight, bias, (ph, pw), output_format="tokens"))

    # Reference: f32 conv (same semantics as nn.Conv2d with stride=kernel).
    y_ref = jax.lax.conv_general_dilated(
        x, weight, window_strides=(ph, pw), padding="VALID",
        dimension_numbers=("NCHW", "OIHW", "NCHW"),
        precision=jax.lax.Precision.HIGHEST,
    ) + bias.reshape(1, E, 1, 1)

    nH, nW = H // ph, W // pw
    assert y.shape == (B, E, nH, nW)
    assert y_tok.shape == (B, nH * nW, E)
    # bf16 operands / bf16 output with f32 accumulation -> loosened tolerance.
    assert jnp.allclose(y.astype(jnp.float32), y_ref, atol=2e-2, rtol=2e-2)
    y_tok_ref = y_ref.transpose(0, 2, 3, 1).reshape(B, nH * nW, E)
    assert jnp.allclose(y_tok.astype(jnp.float32), y_tok_ref, atol=2e-2, rtol=2e-2)

    print("KERNEL_OK")
</pallas_src>

<mosaic_0001>
module attributes {stable_mosaic.version = 11 : i64} {
  func.func @_patch_gemm_kernel(%arg0: i32, %arg1: memref<16x64xbf16, #tpu.memory_space<vmem>>, %arg2: memref<64x128xbf16, #tpu.memory_space<vmem>>, %arg3: memref<1x128xf32, #tpu.memory_space<vmem>>, %arg4: memref<16x128xbf16, #tpu.memory_space<vmem>>) attributes {dimension_semantics = [#tpu.dimension_semantics<parallel>], iteration_bounds = array<i64: 2>, scalar_prefetch = 0 : i64, scratch_operands = 0 : i64, tpu.core_type = #tpu.core_type<tc>, window_params = [{transform_indices = @transform_0, window_bounds = array<i64: 16, 64>}, {pipeline_mode = #tpu.pipeline_mode<synchronous>, transform_indices = @transform_1, window_bounds = array<i64: 64, 128>}, {pipeline_mode = #tpu.pipeline_mode<synchronous>, transform_indices = @transform_2, window_bounds = array<i64: 1, 128>}, {transform_indices = @transform_3, window_bounds = array<i64: 16, 128>}]} {
    %c0 = arith.constant 0 : index
    %c0_0 = arith.constant 0 : index
    %0 = vector.load %arg1[%c0, %c0_0] : memref<16x64xbf16, #tpu.memory_space<vmem>>, vector<16x64xbf16>
    %c0_1 = arith.constant 0 : index
    %c0_2 = arith.constant 0 : index
    %1 = vector.load %arg2[%c0_1, %c0_2] : memref<64x128xbf16, #tpu.memory_space<vmem>>, vector<64x128xbf16>
    %cst = arith.constant dense<0.000000e+00> : vector<16x128xf32>
    %2 = tpu.matmul %0, %1, %cst {dimension_numbers = #tpu.dot_dimension_numbers<[1], [0], [0], [1], [0, 0, 1, 1], [], []>} : vector<16x64xbf16>, vector<64x128xbf16>, vector<16x128xf32> -> vector<16x128xf32>
    %c0_3 = arith.constant 0 : index
    %c0_4 = arith.constant 0 : index
    %3 = vector.load %arg3[%c0_3, %c0_4] : memref<1x128xf32, #tpu.memory_space<vmem>>, vector<1x128xf32>
    %4 = vector.broadcast %3 : vector<1x128xf32> to vector<16x128xf32>
    %5 = arith.addf %2, %4 : vector<16x128xf32>
    %6 = arith.truncf %5 : vector<16x128xf32> to vector<16x128xbf16>
    %c0_5 = arith.constant 0 : index
    %c0_6 = arith.constant 0 : index
    %7 = vector.load %arg4[%c0_5, %c0_6] : memref<16x128xbf16, #tpu.memory_space<vmem>>, vector<16x128xbf16>
    tpu.vector_store %arg4[%c0_5, %c0_6], %6 {strides = array<i32>} : memref<16x128xbf16, #tpu.memory_space<vmem>>, vector<16x128xbf16>,
    return
  }
  func.func @transform_0(%arg0: i32) -> (i32, i32) {
    %c0_i32 = arith.constant 0 : i32
    %c0_i32_0 = arith.constant 0 : i32
    return %arg0, %c0_i32 : i32, i32
  }
  func.func @transform_1(%arg0: i32) -> (i32, i32) {
    %c0_i32 = arith.constant 0 : i32
    %c0_i32_0 = arith.constant 0 : i32
    %c0_i32_1 = arith.constant 0 : i32
    return %c0_i32, %c0_i32_0 : i32, i32
  }
  func.func @transform_2(%arg0: i32) -> (i32, i32) {
    %c0_i32 = arith.constant 0 : i32
    %c0_i32_0 = arith.constant 0 : i32
    %c0_i32_1 = arith.constant 0 : i32
    return %c0_i32, %c0_i32_0 : i32, i32
  }
  func.func @transform_3(%arg0: i32) -> (i32, i32) {
    %c0_i32 = arith.constant 0 : i32
    %c0_i32_0 = arith.constant 0 : i32
    return %arg0, %c0_i32 : i32, i32
  }
}

</mosaic_0001>

<bundles_post_ra>
// kernel: tpu_custom_call.1
= control target key start
LH: loop header
LB: loop body
LE: loop exit
PB: predicated region body
PF: predicated region fallthrough
CT: control target
= control target key end

     0   :  { %8 = vsyncpa [#allocation3], 0  ;;  %s790_s0 = inlined_call_operand.hbm [shape: bf16[32,64], index: 0, kind: input, shape index: {}]   ;;  %s791_s1 = inlined_call_operand.hbm [shape: bf16[64,128], index: 1, kind: input, shape index: {}]   ;;  %s792_s2 = inlined_call_operand.vmem [shape: f32[1,128], index: 2, kind: input, shape index: {}]   ;;  %s793_s3 = inlined_call_operand.hbm [shape: bf16[32,128], index: 3, kind: output, shape index: {}]  }
   0x1   :  { %10 = vsyncpa [#allocation3 + $0x1], 0 }
   0x2   :  { %11 = vsyncpa [#allocation6], 0 }
   0x3   :  { %12 = vsyncpa [#allocation4], 0 }
   0x4   :  { %14 = vsyncpa [#allocation4 + $0x1], 0  ;;  %s643_s12 = smov 0   ;;  %s645_s13 = smov 0  }
   0x5   :  { %s647_s14 = smov 0   ;;  %s649_s15 = smov 0  }
   0x6 LB: > { %s664_s16 = sadd.s32 4294967295, %s616_s15   ;;  %s375_s17 = sadd.s32 4294967294, %s616_s15   ;;  %s616_s15 = sphi %s649_s15, %s803_s15   ;;  %s612_s14 = sphi %s647_s14, %s802_s14   ;;  %s608_s13 = sphi %s645_s13, %s801_s13   ;;  %s604_s12 = sphi %s643_s12, %s800_s12  }
   0x7   : > { %p40_p0 = scmp.ne.s32.totalorder %s608_s13, %s604_s12  ;;  %p41_p1 = scmp.eq.s32.totalorder %s664_s16, 0 }
   0x8   : > { %p106_p2 = scmp.eq.s32.totalorder %s664_s16, 1  ;;  %p112_p3 = scmp.eq.s32.totalorder %s375_s17, 1 }
   0x9   : > { %p673_p4 = por %p41_p1, %p40_p0  ;;  %p376_p5 = scmp.ge.s32.totalorder %s616_s15, 1 }
   0xa   : > { %p678_p6 = por %p112_p3, %p40_p0  ;;  %p119_p7 = scmp.lt.s32.totalorder %s616_s15, 3 }
   0xb   : > { %s130_s22 = sshll.u32 %s791_s1, 4  ;;  %s618_s24 = smov [#allocation5]   ;;  %s131_s22 = int_to_ptr.hbm [resolvable:$true] %s130_s22 }
   0xc   : > { %p686_p8 = pnand %p376_p5, %p119_p7  ;;  %s132_s25 = sshll.u32 %s618_s24, 4  ;;  %s133_s25 = int_to_ptr.vmem [resolvable:$true] %s132_s25 }
   0xd   : > { %s696_s26 = sadd.s32 1, %s616_s15   ;;  %s619_s27 = smov 64  }
   0xe   : > { %p432_p9 = pneg %p686_p8  ;;  %s620_s28 = smov 4  }
   0xf   : > { %s24_s29 = ssub.s32 %s616_s15, %s696_s26  ;;  %s27_s30 = sadd.s32 1, %s612_s14 }
  0x10   : > { %p433_p10 = pnand %p432_p9, %p41_p1  ;;  %p25_p12 = scmp.eq.s32.totalorder %s24_s29, 0 }
  0x11   : > { %p34_p13 = scmp.ne.s32.totalorder %s612_s14, %s608_s13  ;;  %p35_p0 = scmp.eq.s32.totalorder %s616_s15, 0 }
  0x12   : > { %435 = dma.hbm_to_vmem [thread:$0]  (!%p433_p10), %s131_s22, 512, %s133_s25, [#allocation6], %s619_s27, %s619_s27, %s620_s28  }
  0x13   : > { %s708_s4 = scalar_select %p25_p12, %s612_s14, %s27_s30  }
  0x14   : > { %p712_p3 = por %p106_p2, %p34_p13  ;;  %p445_p5 = scmp.lt.s32.totalorder %s616_s15, 2 }
  0x15   : > { %s149_s6 = sand.u32 1, %s612_s14   ;;  %s412_s7 = sshll.u32 %s616_s15, 3 }
  0x16   : > { %p36_p7 = por %p35_p0, %p34_p13  ;;  %s379_s8 = sshll.u32 %s149_s6, 3 }
  0x17   : > { %s158_s11 = scalar_lea.hbm %s790_s0, %s412_s7  ;;  %s153_s20 = scalar_lea.vmem [#allocation2], %s379_s8 }
  0x18   : > { %s159_s17 = sshll.u32 %s158_s11, 4  ;;  %s161_s21 = sshll.u32 %s153_s20, 4  ;;  %s160_s17 = int_to_ptr.hbm [resolvable:$true] %s159_s17  ;;  %s162_s21 = int_to_ptr.vmem [resolvable:$true] %s161_s21 }
  0x19   : > { %p722_p9 = pnand %p445_p5, %p36_p7  ;;  %s150_s24 = scalar_lea.sflag [#allocation3], %s149_s6 }
  0x1a   : > { %s516_s25 = sshra.s32 %s160_s17, 4  ;;  %s523_s8 = scalar_lea.hbm %s790_s0, 16  ;;  %s517_s25 = int_to_ptr.hbm [resolvable:$true] %s516_s25 }
  0x1b   : > { %s518_s29 = scalar_lea.hbm %s517_s25, 8  ;;  %p520_p10 = pneg %p722_p9 }
  0x1c   : > { %p519_p2 = scmp.ne.s32.totalorder %s517_s25, %s518_s29  ;;  %p524_p0 = scmp.lt.s32.totalorder %s517_s25, %s790_s0 }
  0x1d   : > { %p525_p5 = scmp.lt.s32.totalorder %s523_s8, %s518_s29 }
  0x1e   : > { %p521_p12 = pnand %p520_p10, %p519_p2 }
  0x1f   : > { %p526_p7 = por %p525_p5, %p524_p0 }
  0x20   : > { %p522_p13 = pneg %p521_p12 }
  0x22   : > { %p527_p11 = pnand %p526_p7, %p522_p13 }
  0x24   : > { %530 = shalt.err (!%p527_p11)
}
  0x25   : > { %439 = dma.hbm_to_vmem [thread:$0]  (!%p722_p9), %s160_s17, 128, %s162_s21, %s150_s24, %s619_s27, %s619_s27, %s620_s28  }
  0x26   : > { %173 = sbr.rel (%p686_p8) target bundleno = 204 (0xcc), region = 32  ;;  %s742_s6 = sand.u32 (!%p686_p8), 1, %s608_s13  }
  0x27   : > { %s383_s11 = sshll.u32 (!%p686_p8), %s742_s6, 3  ;;  %s176_s20 = scalar_lea.sflag (!%p686_p8), [#allocation3], %s742_s6 }
  0x28   : > { %s179_s25 = scalar_lea.vmem (!%p686_p8), [#allocation2], %s383_s11 }
  0x2b   : > { %591 = dma.done.wait (%p673_p4), %s176_s20, 128  }
  0x2c   : > { %593 = vsyncadd (%p673_p4), %s176_s20, 4294967168 }
  0x2d   : > { %595 = dma.done.wait (%p41_p1), [#allocation6], 512  }
  0x2e   : > { %597 = vsyncadd (%p41_p1), [#allocation6], 4294966784  ;;  %v417_v0 = vld [vmem:[#allocation5 + $0x18] sm:$0xff]  ;;  %v416_v1 = vld [vmem:[#allocation5 + $0x10] sm:$0xff]  ;;  %vm254_vm0 = vcmask 523264   ;;  %s418_s18 = sshll.u32 %s664_s16, 3 }
  0x2f   : > { %262 = vmatpush.bf16.msra.mxu0 %v417_v0  ;;  %v415_v2 = vld [vmem:[#allocation5 + $0x8] sm:$0xff]  ;;  %v414_v3 = vld [vmem:[#allocation5] sm:$0xff]  ;;  %v413_v4 = vld [vmem:[%s179_s25] sm:$0xff]  ;;  %s288_s28 = scalar_lea.hbm %s793_s3, %s418_s18  ;;  %s207_s22 = scalar_lea.vmem [#allocation7], %s383_s11 }
  0x30   : > { %v485_v6 = vld [vmem:[%s792_s2] ss:$0 sm:$0xff]  ;;  %s289_s24 = sshll.u32 %s207_s22, 4  ;;  %s291_s29 = sshll.u32 %s288_s28, 4  ;;  %s290_s24 = int_to_ptr.vmem [resolvable:$true] %s289_s24  ;;  %s292_s29 = int_to_ptr.hbm [resolvable:$true] %s291_s29 }
  0x31   : > { %s277_s16 = scalar_lea.sflag [#allocation4], %s742_s6  ;;  %s560_s30 = sshra.s32 %s292_s29, 4  ;;  %s561_s30 = int_to_ptr.hbm [resolvable:$true] %s560_s30 }
  0x32   : > { %s562_s7 = scalar_lea.hbm %s561_s30, 8  ;;  %s566_s10 = scalar_lea.hbm %s793_s3, 16 }
  0x33   : > { %263 = vmatpush.bf16.msra.mxu0 %v416_v1  ;;  %p563_p1 = scmp.ne.s32.totalorder %s561_s30, %s562_s7  ;;  %p567_p11 = scmp.lt.s32.totalorder %s561_s30, %s793_s3 }
  0x34   : > { %p568_p9 = scmp.lt.s32.totalorder %s566_s10, %s562_s7 }
  0x35   : > { %p564_p4 = pnand %p563_p1, %p712_p3 }
  0x36   : > { %p569_p2 = por %p568_p9, %p567_p11 }
  0x37   : > { %264 = vmatpush.bf16.msra.mxu0 %v415_v2  ;;  %p565_p8 = pneg %p564_p4 }
  0x39   : > { %p570_p10 = pnand %p569_p2, %p565_p8 }
  0x3b   : > { %265 = vmatpush.bf16.msra.mxu0 %v414_v3 }
  0x3e   : > { %406 = vmatmul.msk.bf16.vlgmr.msra.gmra.mxu0 %vm254_vm0, %v413_v4 }
  0xbb   : > { %v267_v5 = vpop.f32.mrf.mxu0 }
  0xbc   : > { %v268_v8 = vadd.f32 %v485_v6, %v267_v5 }
  0xc3   : > { %v269_v7 = vpop.f32.mrf.mxu0 }
  0xc4   : > { %v270_v9 = vadd.f32 %v485_v6, %v269_v7 }
  0xc6   : > { %v422_v10 = vpack.c.bf16 %v270_v9, %v268_v8 }
  0xc8   : > { %423 = vst [vmem:[%s207_s22] sm:$0xff] %v422_v10  }
  0xc9   : > { %573 = shalt.err (!%p570_p10)
}
  0xca   : > { %s621_s6 = smov 64   ;;  %s622_s25 = smov 4  }
  0xcb   : > { %430 = dma.vmem_to_hbm [thread:$0]  (%p712_p3), %s290_s24, 128, %s292_s29, %s277_s16, %s621_s6, %s621_s6, %s622_s25  }
  0xcc PF: > { %s306_s18 = sand.u32 1, %s604_s12   ;;  %p799_p12 = scmp.ge.s32.totalorder %s616_s15, 2 }
  0xcd   : > { %s307_s23 = scalar_lea.sflag [#allocation4], %s306_s18 }
  0xce   : > { %p441_p13 = pnand %p799_p12, %p678_p6 }
  0xd0   : > { %p442_p0 = pneg %p441_p13 }
  0xd2   : > { %599 = dma.done.wait (%p442_p0), %s307_s23, 128  }
  0xd3   : > { %601 = vsyncadd (%p442_p0), %s307_s23, 4294967168  ;;  %p17_p5 = scmp.ge.s32.totalorder %s696_s26, 4   ;;  %s800_s12 = smov %s608_s13 }
  0xd4   : > { %s801_s13 = smov %s612_s14  ;;  %s802_s14 = smov %s708_s4 }
  0xd5   : > { %s803_s15 = smov %s696_s26  ;;  %19 = sbr.rel (!%p17_p5) target bundleno = 6 (0x6), region = 81 }
  0xda   :  { %313 = vsyncpa [#allocation3], 1 }
  0xdb   :  { %315 = vsyncpa [#allocation3 + $0x1], 1 }
  0xdc   :  { %316 = vsyncpa [#allocation6], 1 }
  0xdd   :  { %317 = vsyncpa [#allocation4], 1 }
  0xde   :  { %319 = vsyncpa [#allocation4 + $0x1], 1 }

</bundles_post_ra>
